<compile_context>
chip_gen: v6e
topology: v6e:2x2x1
jax: 0.10.0
libtpu: 0.0.40
codegen_flags: <defaults>
</compile_context>

<pallas_src>
import functools

import jax
import jax.numpy as jnp
from jax.experimental import pallas as pl
from jax.experimental.pallas import tpu as pltpu

HIDDEN = 64          # hidden width of every Linear
PAD = 128            # lane width: two examples per row (lanes 0-63 / 64-127)
N_FUSED = 5          # 6 Linear layers with the activation-free L2/L3 pair folded
# After the fold: SiLU follows layers 0,1,2,3; layer 4 (the last) has none.


def _round_up(n, m):
    return (n + m - 1) // m * m


# --------------------------------------------------------------------------
# Kernel
# --------------------------------------------------------------------------
def sbm_kernel(x_ref, w_ref, b_ref, o_ref):
    """x_ref: (tm, 128) f32 — two examples per row.
    w_ref: (5, 128, 128) bf16 block-diagonal weights.
    b_ref: (5, 1, 128) f32 tiled biases.
    o_ref: (tm, 128) f32."""
    h = x_ref[...].astype(jnp.bfloat16)               # single input cast
    for i in range(N_FUSED):
        # bf16 x bf16 -> f32 accumulation on the MXU.
        z = jnp.dot(h, w_ref[i], preferred_element_type=jnp.float32) + b_ref[i]
        if i < N_FUSED - 1:
            # SiLU(z) = z * sigmoid(z); sigmoid via EUP exp + approx reciprocal
            # (keeps the divide off the VPU).  Epilogue stays f32 (v5e-safe),
            # result cast to bf16 once for the next MXU pass.
            sig = pl.reciprocal(1.0 + jnp.exp(-z), approx=True)
            h = (z * sig).astype(jnp.bfloat16)
        else:
            o_ref[...] = z.astype(o_ref.dtype)


# --------------------------------------------------------------------------
# One-time parameter preparation (call once per parameter set, outside jit path)
# --------------------------------------------------------------------------
def prepare_params(params):
    """Fold the activation-free L2->L3 pair in f32, then pack every remaining
    layer as a 128x128 block-diagonal matrix (two examples per lane-row) and
    cast weights to bf16 once.  Returns (w_stack (5,128,128) bf16,
    b_stack (5,1,128) f32)."""
    (w0, b0), (w1, b1), (w2, b2), (w3, b3), (w4, b4), (w5, b5) = params
    hi = jax.lax.Precision.HIGHEST
    w23 = jnp.dot(w2, w3, precision=hi)               # (64,64) exact-ish f32 fold
    b23 = jnp.dot(b2, w3, precision=hi) + b3          # (1,64)
    folded = [(w0, b0), (w1, b1), (w23, b23), (w4, b4), (w5, b5)]

    w_stack = jnp.zeros((N_FUSED, PAD, PAD), jnp.float32)
    b_stack = jnp.zeros((N_FUSED, 1, PAD), jnp.float32)
    for i, (w, b) in enumerate(folded):
        fi, fo = w.shape
        w_stack = w_stack.at[i, :fi, :fo].set(w)                              # block A
        w_stack = w_stack.at[i, HIDDEN:HIDDEN + fi, HIDDEN:HIDDEN + fo].set(w)  # block B
        b_stack = b_stack.at[i, 0, :fo].set(b[0])
        b_stack = b_stack.at[i, 0, HIDDEN:HIDDEN + fo].set(b[0])
    return w_stack.astype(jnp.bfloat16), b_stack


# --------------------------------------------------------------------------
# Forward (jitted; pad / pack / unpack fuse into the surrounding graph)
# --------------------------------------------------------------------------
@functools.partial(jax.jit, static_argnames=("tm",))
def sbmnet_forward(x, w_stack, b_stack, *, tm=512):
    """x: (B, input_size) f32.  w_stack/b_stack from prepare_params."""
    B, input_size = x.shape
    assert input_size <= HIDDEN
    assert tm % 8 == 0
    Bp = _round_up(B, 2 * tm)          # padded batch (pairs of rows)
    Bh = Bp // 2                       # packed rows: 2 examples per 128-lane row

    # Row-pad the batch, then pack example r into lanes [0:in) and example
    # Bh+r into lanes [64:64+in) of packed row r.  Fused by XLA under jit.
    xr = jnp.zeros((Bp, input_size), x.dtype).at[:B].set(x)
    xp = jnp.zeros((Bh, PAD), x.dtype)
    xp = xp.at[:, :input_size].set(xr[:Bh])
    xp = xp.at[:, HIDDEN:HIDDEN + input_size].set(xr[Bh:])

    grid = (Bh // tm,)

    # Advisory cost estimate (packed shapes; exp + reciprocal per SiLU element).
    flops = 2 * Bh * N_FUSED * PAD * PAD
    transcendentals = 2 * (N_FUSED - 1) * Bh * PAD
    bytes_accessed = (2 * Bh * PAD * 4            # input + output slabs
                      + N_FUSED * PAD * PAD * 2   # bf16 weights
                      + N_FUSED * PAD * 4)        # f32 biases

    out = pl.pallas_call(
        sbm_kernel,
        out_shape=jax.ShapeDtypeStruct((Bh, PAD), x.dtype),
        grid_spec=pltpu.PrefetchScalarGridSpec(
            num_scalar_prefetch=0,
            grid=grid,
            in_specs=[
                pl.BlockSpec((tm, PAD), lambda i: (i, 0)),
                # Constant block index -> weights/biases stay VMEM-resident.
                pl.BlockSpec((N_FUSED, PAD, PAD), lambda i: (0, 0, 0)),
                pl.BlockSpec((N_FUSED, 1, PAD), lambda i: (0, 0, 0)),
            ],
            out_specs=pl.BlockSpec((tm, PAD), lambda i: (i, 0)),
        ),
        compiler_params=pltpu.CompilerParams(
            dimension_semantics=("parallel",)),
        cost_estimate=pl.CostEstimate(
            flops=flops,
            transcendentals=transcendentals,
            bytes_accessed=bytes_accessed),
    )(xp, w_stack, b_stack)

    # Unpack the two examples per row and strip batch padding (fused under jit).
    out_full = jnp.concatenate(
        [out[:, :input_size], out[:, HIDDEN:HIDDEN + input_size]], axis=0)
    return out_full[:B]


# --------------------------------------------------------------------------
# Parameter init (mirrors PyTorch Linear init; W stored as (in, out))
# --------------------------------------------------------------------------
def init_params(key, input_size):
    dims = [
        (input_size, HIDDEN), (HIDDEN, HIDDEN), (HIDDEN, HIDDEN),   # encoder
        (HIDDEN, HIDDEN), (HIDDEN, HIDDEN), (HIDDEN, input_size),   # decoder
    ]
    params = []
    for (fan_in, fan_out) in dims:
        key, kw, kb = jax.random.split(key, 3)
        scale = 1.0 / jnp.sqrt(fan_in)
        w = jax.random.uniform(kw, (fan_in, fan_out), jnp.float32, -scale, scale)
        b = jax.random.uniform(kb, (1, fan_out), jnp.float32, -scale, scale)
        params.append((w, b))
    return params


def sbmnet_reference(x, params):
    """Pure-JAX f32 reference with the original (unfolded) 6-layer structure."""
    hi = jax.lax.Precision.HIGHEST
    h = x.astype(jnp.float32)
    for i, (w, b) in enumerate(params):
        z = jnp.dot(h, w, precision=hi) + b
        h = z * jax.nn.sigmoid(z) if i in (0, 1, 3, 4) else z
    return h


if __name__ == "__main__":
    key = jax.random.PRNGKey(0)
    kx, kp = jax.random.split(key)

    B = 256
    input_size = 32
    x = jax.random.normal(kx, (B, input_size), jnp.float32)
    params = init_params(kp, input_size)

    # One-time prep (fold + block-diag pack + bf16 cast), reused every forward.
    w_stack, b_stack = prepare_params(params)

    # tm=64 -> packed rows 128, grid=(2,): even grid so v7x uses both TCs.
    out = sbmnet_forward(x, w_stack, b_stack, tm=64)
    out = jax.block_until_ready(out)

    ref = sbmnet_reference(x, params)
    assert out.shape == (B, input_size)
    # Kernel runs bf16 MXU inputs / f32 accumulation + approx reciprocal;
    # f32 reference tolerance sized for that precision split.
    assert jnp.allclose(out, ref, atol=2e-2, rtol=2e-2), "mismatch vs reference"

    print("KERNEL_OK")
</pallas_src>

<mosaic_0001>
module attributes {stable_mosaic.version = 11 : i64} {
  func.func @sbm_kernel(%arg0: i32, %arg1: memref<64x128xf32, #tpu.memory_space<vmem>>, %arg2: memref<5x128x128xbf16, #tpu.memory_space<vmem>>, %arg3: memref<5x1x128xf32, #tpu.memory_space<vmem>>, %arg4: memref<64x128xf32, #tpu.memory_space<vmem>>) attributes {dimension_semantics = [#tpu.dimension_semantics<parallel>], iteration_bounds = array<i64: 2>, scalar_prefetch = 0 : i64, scratch_operands = 0 : i64, tpu.core_type = #tpu.core_type<tc>, window_params = [{transform_indices = @transform_0, window_bounds = array<i64: 64, 128>}, {pipeline_mode = #tpu.pipeline_mode<synchronous>, transform_indices = @transform_1, window_bounds = array<i64: 5, 128, 128>}, {pipeline_mode = #tpu.pipeline_mode<synchronous>, transform_indices = @transform_2, window_bounds = array<i64: 5, 1, 128>}, {transform_indices = @transform_3, window_bounds = array<i64: 64, 128>}]} {
    %c0 = arith.constant 0 : index
    %c0_0 = arith.constant 0 : index
    %0 = vector.load %arg1[%c0, %c0_0] : memref<64x128xf32, #tpu.memory_space<vmem>>, vector<64x128xf32>
    %1 = arith.truncf %0 : vector<64x128xf32> to vector<64x128xbf16>
    %c0_1 = arith.constant 0 : index
    %c0_2 = arith.constant 0 : index
    %c0_3 = arith.constant 0 : index
    %2 = vector.load %arg2[%c0_1, %c0_2, %c0_3] : memref<5x128x128xbf16, #tpu.memory_space<vmem>>, vector<1x128x128xbf16>
    %3 = vector.shape_cast %2 : vector<1x128x128xbf16> to vector<128x128xbf16>
    %cst = arith.constant dense<0.000000e+00> : vector<64x128xf32>
    %4 = tpu.matmul %1, %3, %cst {dimension_numbers = #tpu.dot_dimension_numbers<[1], [0], [0], [1], [0, 0, 1, 1], [], []>} : vector<64x128xbf16>, vector<128x128xbf16>, vector<64x128xf32> -> vector<64x128xf32>
    %c0_4 = arith.constant 0 : index
    %c0_5 = arith.constant 0 : index
    %c0_6 = arith.constant 0 : index
    %5 = vector.load %arg3[%c0_4, %c0_5, %c0_6] : memref<5x1x128xf32, #tpu.memory_space<vmem>>, vector<1x1x128xf32>
    %6 = vector.shape_cast %5 : vector<1x1x128xf32> to vector<1x128xf32>
    %7 = vector.broadcast %6 : vector<1x128xf32> to vector<64x128xf32>
    %8 = arith.addf %4, %7 : vector<64x128xf32>
    %cst_7 = arith.constant 0.000000e+00 : f32
    %9 = vector.broadcast %cst_7 : f32 to vector<64x128xf32>
    %10 = arith.subf %9, %8 : vector<64x128xf32>
    %11 = math.exp %10 : vector<64x128xf32>
    %cst_8 = arith.constant 1.000000e+00 : f32
    %12 = vector.broadcast %cst_8 : f32 to vector<64x128xf32>
    %13 = arith.addf %12, %11 : vector<64x128xf32>
    %14 = tpu.reciprocal %13 {approx = true} : vector<64x128xf32> -> vector<64x128xf32>
    %15 = arith.mulf %8, %14 : vector<64x128xf32>
    %16 = arith.truncf %15 : vector<64x128xf32> to vector<64x128xbf16>
    %c1 = arith.constant 1 : index
    %c0_9 = arith.constant 0 : index
    %c0_10 = arith.constant 0 : index
    %17 = vector.load %arg2[%c1, %c0_9, %c0_10] : memref<5x128x128xbf16, #tpu.memory_space<vmem>>, vector<1x128x128xbf16>
    %18 = vector.shape_cast %17 : vector<1x128x128xbf16> to vector<128x128xbf16>
    %cst_11 = arith.constant dense<0.000000e+00> : vector<64x128xf32>
    %19 = tpu.matmul %16, %18, %cst_11 {dimension_numbers = #tpu.dot_dimension_numbers<[1], [0], [0], [1], [0, 0, 1, 1], [], []>} : vector<64x128xbf16>, vector<128x128xbf16>, vector<64x128xf32> -> vector<64x128xf32>
    %c1_12 = arith.constant 1 : index
    %c0_13 = arith.constant 0 : index
    %c0_14 = arith.constant 0 : index
    %20 = vector.load %arg3[%c1_12, %c0_13, %c0_14] : memref<5x1x128xf32, #tpu.memory_space<vmem>>, vector<1x1x128xf32>
    %21 = vector.shape_cast %20 : vector<1x1x128xf32> to vector<1x128xf32>
    %22 = vector.broadcast %21 : vector<1x128xf32> to vector<64x128xf32>
    %23 = arith.addf %19, %22 : vector<64x128xf32>
    %cst_15 = arith.constant 0.000000e+00 : f32
    %24 = vector.broadcast %cst_15 : f32 to vector<64x128xf32>
    %25 = arith.subf %24, %23 : vector<64x128xf32>
    %26 = math.exp %25 : vector<64x128xf32>
    %cst_16 = arith.constant 1.000000e+00 : f32
    %27 = vector.broadcast %cst_16 : f32 to vector<64x128xf32>
    %28 = arith.addf %27, %26 : vector<64x128xf32>
    %29 = tpu.reciprocal %28 {approx = true} : vector<64x128xf32> -> vector<64x128xf32>
    %30 = arith.mulf %23, %29 : vector<64x128xf32>
    %31 = arith.truncf %30 : vector<64x128xf32> to vector<64x128xbf16>
    %c2 = arith.constant 2 : index
    %c0_17 = arith.constant 0 : index
    %c0_18 = arith.constant 0 : index
    %32 = vector.load %arg2[%c2, %c0_17, %c0_18] : memref<5x128x128xbf16, #tpu.memory_space<vmem>>, vector<1x128x128xbf16>
    %33 = vector.shape_cast %32 : vector<1x128x128xbf16> to vector<128x128xbf16>
    %cst_19 = arith.constant dense<0.000000e+00> : vector<64x128xf32>
    %34 = tpu.matmul %31, %33, %cst_19 {dimension_numbers = #tpu.dot_dimension_numbers<[1], [0], [0], [1], [0, 0, 1, 1], [], []>} : vector<64x128xbf16>, vector<128x128xbf16>, vector<64x128xf32> -> vector<64x128xf32>
    %c2_20 = arith.constant 2 : index
    %c0_21 = arith.constant 0 : index
    %c0_22 = arith.constant 0 : index
    %35 = vector.load %arg3[%c2_20, %c0_21, %c0_22] : memref<5x1x128xf32, #tpu.memory_space<vmem>>, vector<1x1x128xf32>
    %36 = vector.shape_cast %35 : vector<1x1x128xf32> to vector<1x128xf32>
    %37 = vector.broadcast %36 : vector<1x128xf32> to vector<64x128xf32>
    %38 = arith.addf %34, %37 : vector<64x128xf32>
    %cst_23 = arith.constant 0.000000e+00 : f32
    %39 = vector.broadcast %cst_23 : f32 to vector<64x128xf32>
    %40 = arith.subf %39, %38 : vector<64x128xf32>
    %41 = math.exp %40 : vector<64x128xf32>
    %cst_24 = arith.constant 1.000000e+00 : f32
    %42 = vector.broadcast %cst_24 : f32 to vector<64x128xf32>
    %43 = arith.addf %42, %41 : vector<64x128xf32>
    %44 = tpu.reciprocal %43 {approx = true} : vector<64x128xf32> -> vector<64x128xf32>
    %45 = arith.mulf %38, %44 : vector<64x128xf32>
    %46 = arith.truncf %45 : vector<64x128xf32> to vector<64x128xbf16>
    %c3 = arith.constant 3 : index
    %c0_25 = arith.constant 0 : index
    %c0_26 = arith.constant 0 : index
    %47 = vector.load %arg2[%c3, %c0_25, %c0_26] : memref<5x128x128xbf16, #tpu.memory_space<vmem>>, vector<1x128x128xbf16>
    %48 = vector.shape_cast %47 : vector<1x128x128xbf16> to vector<128x128xbf16>
    %cst_27 = arith.constant dense<0.000000e+00> : vector<64x128xf32>
    %49 = tpu.matmul %46, %48, %cst_27 {dimension_numbers = #tpu.dot_dimension_numbers<[1], [0], [0], [1], [0, 0, 1, 1], [], []>} : vector<64x128xbf16>, vector<128x128xbf16>, vector<64x128xf32> -> vector<64x128xf32>
    %c3_28 = arith.constant 3 : index
    %c0_29 = arith.constant 0 : index
    %c0_30 = arith.constant 0 : index
    %50 = vector.load %arg3[%c3_28, %c0_29, %c0_30] : memref<5x1x128xf32, #tpu.memory_space<vmem>>, vector<1x1x128xf32>
    %51 = vector.shape_cast %50 : vector<1x1x128xf32> to vector<1x128xf32>
    %52 = vector.broadcast %51 : vector<1x128xf32> to vector<64x128xf32>
    %53 = arith.addf %49, %52 : vector<64x128xf32>
    %cst_31 = arith.constant 0.000000e+00 : f32
    %54 = vector.broadcast %cst_31 : f32 to vector<64x128xf32>
    %55 = arith.subf %54, %53 : vector<64x128xf32>
    %56 = math.exp %55 : vector<64x128xf32>
    %cst_32 = arith.constant 1.000000e+00 : f32
    %57 = vector.broadcast %cst_32 : f32 to vector<64x128xf32>
    %58 = arith.addf %57, %56 : vector<64x128xf32>
    %59 = tpu.reciprocal %58 {approx = true} : vector<64x128xf32> -> vector<64x128xf32>
    %60 = arith.mulf %53, %59 : vector<64x128xf32>
    %61 = arith.truncf %60 : vector<64x128xf32> to vector<64x128xbf16>
    %c4 = arith.constant 4 : index
    %c0_33 = arith.constant 0 : index
    %c0_34 = arith.constant 0 : index
    %62 = vector.load %arg2[%c4, %c0_33, %c0_34] : memref<5x128x128xbf16, #tpu.memory_space<vmem>>, vector<1x128x128xbf16>
    %63 = vector.shape_cast %62 : vector<1x128x128xbf16> to vector<128x128xbf16>
    %cst_35 = arith.constant dense<0.000000e+00> : vector<64x128xf32>
    %64 = tpu.matmul %61, %63, %cst_35 {dimension_numbers = #tpu.dot_dimension_numbers<[1], [0], [0], [1], [0, 0, 1, 1], [], []>} : vector<64x128xbf16>, vector<128x128xbf16>, vector<64x128xf32> -> vector<64x128xf32>
    %c4_36 = arith.constant 4 : index
    %c0_37 = arith.constant 0 : index
    %c0_38 = arith.constant 0 : index
    %65 = vector.load %arg3[%c4_36, %c0_37, %c0_38] : memref<5x1x128xf32, #tpu.memory_space<vmem>>, vector<1x1x128xf32>
    %66 = vector.shape_cast %65 : vector<1x1x128xf32> to vector<1x128xf32>
    %67 = vector.broadcast %66 : vector<1x128xf32> to vector<64x128xf32>
    %68 = arith.addf %64, %67 : vector<64x128xf32>
    %c0_39 = arith.constant 0 : index
    %c0_40 = arith.constant 0 : index
    %69 = vector.load %arg4[%c0_39, %c0_40] : memref<64x128xf32, #tpu.memory_space<vmem>>, vector<64x128xf32>
    tpu.vector_store %arg4[%c0_39, %c0_40], %68 {strides = array<i32>} : memref<64x128xf32, #tpu.memory_space<vmem>>, vector<64x128xf32>,
    return
  }
  func.func @transform_0(%arg0: i32) -> (i32, i32) {
    %c0_i32 = arith.constant 0 : i32
    %c0_i32_0 = arith.constant 0 : i32
    return %arg0, %c0_i32 : i32, i32
  }
  func.func @transform_1(%arg0: i32) -> (i32, i32, i32) {
    %c0_i32 = arith.constant 0 : i32
    %c0_i32_0 = arith.constant 0 : i32
    %c0_i32_1 = arith.constant 0 : i32
    %c0_i32_2 = arith.constant 0 : i32
    return %c0_i32, %c0_i32_0, %c0_i32_1 : i32, i32, i32
  }
  func.func @transform_2(%arg0: i32) -> (i32, i32, i32) {
    %c0_i32 = arith.constant 0 : i32
    %c0_i32_0 = arith.constant 0 : i32
    %c0_i32_1 = arith.constant 0 : i32
    %c0_i32_2 = arith.constant 0 : i32
    return %c0_i32, %c0_i32_0, %c0_i32_1 : i32, i32, i32
  }
  func.func @transform_3(%arg0: i32) -> (i32, i32) {
    %c0_i32 = arith.constant 0 : i32
    %c0_i32_0 = arith.constant 0 : i32
    return %arg0, %c0_i32 : i32, i32
  }
}

</mosaic_0001>

<bundles_post_ra>
// kernel: sbmnet_forward.1
= control target key start
LH: loop header
LB: loop body
LE: loop exit
PB: predicated region body
PF: predicated region fallthrough
CT: control target
= control target key end

     0   :  { %s1671_s12 = smov 0   ;;  %s1888_s0 = inlined_call_operand.vmem [shape: f32[128,128], index: 0, kind: input, shape index: {}]   ;;  %s1889_s1 = inlined_call_operand.vmem [shape: bf16[5,128,128], index: 1, kind: input, shape index: {}]   ;;  %s1890_s2 = inlined_call_operand.vmem [shape: f32[5,1,128], index: 2, kind: input, shape index: {}]   ;;  %s1891_s3 = inlined_call_operand.vmem [shape: f32[128,128], index: 3, kind: output, shape index: {}]  }
   0x1 LB: > { %s1147_s13 = sadd.s32 4294967295, %s1649_s12   ;;  %p1151_p0 = scmp.ge.s32.totalorder %s1649_s12, 1  ;;  %s1649_s12 = sphi %s1671_s12, %s13_s12  }
   0x2   : > { %p138_p1 = scmp.lt.s32.totalorder %s1649_s12, 3 }
   0x4   : > { %p139_p2 = pnand %p1151_p0, %p138_p1 }
   0x5   : > { %s1152_s16 = sshll.u32 (!%p139_p2), %s1147_s13, 3 }
   0x6   : > { %142 = sbr.rel (%p139_p2) target bundleno = 1214 (0x4be), region = 32  ;;  %p163_p3 = scmp.lt.s32.totalorder (!%p139_p2), %s1152_s16, 15 }
   0xb   : > { %v1475_v0 = vld [vmem:[%s1889_s1 + $0x38] sm:$0xff]   ;;  %v1476_v1 = vld [vmem:[%s1889_s1 + $0x30] sm:$0xff]   ;;  %s1893_s16 = smov (!%p163_p3, %s1152_s16), 15  ;;  %v1477_v2 = vld [vmem:[%s1889_s1 + $0x28] sm:$0xff]  }
   0xc   : > { %1331 = vmatprep.subr.bf16.mxu0 %v1475_v0  ;;  %s1153_s21 = sshll.u32 %s1893_s16, 3  ;;  %v1478_v3 = vld [vmem:[%s1889_s1 + $0x20] sm:$0xff]   ;;  %v1479_v7 = vld [vmem:[%s1889_s1 + $0x18] sm:$0xff]   ;;  %v1480_v8 = vld [vmem:[%s1889_s1 + $0x10] sm:$0xff]  }
   0xd   : > { %1332 = vmatpush3.bf16.msra.mxu0 %v1475_v0  ;;  %s1696_s24 = scalar_lea.vmem %s1888_s0, %s1153_s21  ;;  %v1481_v9 = vld [vmem:[%s1889_s1 + $0x8] sm:$0xff]   ;;  %v1482_v10 = vld [vmem:[%s1889_s1] sm:$0xff]   ;;  %v1483_v20 = vld [vmem:[%s1889_s1 + $0x78] sm:$0xff]   ;;  %s172_s13 = scalar_lea.vmem %s1891_s3, %s1153_s21 }
   0xe   : > { %1333 = vmatprep.subr.bf16.mxu0 %v1476_v1  ;;  %v175_v4 = vld [vmem:[%s1696_s24] sm:$0xff]  ;;  %v176_v5 = vld [vmem:[%s1696_s24 + $0x8] sm:$0xff]  ;;  %v177_v11 = vld [vmem:[%s1696_s24 + $0x10] sm:$0xff]  ;;  %1355 = vmatprep.subr.bf16.mxu1 %v1483_v20 }
   0xf   : > { %v183_v6 = vpack.c.bf16 %v176_v5, %v175_v4  ;;  %v178_v12 = vld [vmem:[%s1696_s24 + $0x18] sm:$0xff]  ;;  %v179_v13 = vld [vmem:[%s1696_s24 + $0x20] sm:$0xff]  ;;  %v180_v14 = vld [vmem:[%s1696_s24 + $0x28] sm:$0xff]  ;;  %1356 = vmatpush3.bf16.msra.mxu1 %v1483_v20 }
  0x10   : > { %v184_v15 = vpack.c.bf16 %v178_v12, %v177_v11  ;;  %v185_v16 = vpack.c.bf16 %v180_v14, %v179_v13  ;;  %v181_v17 = vld [vmem:[%s1696_s24 + $0x30] sm:$0xff]  ;;  %v182_v18 = vld [vmem:[%s1696_s24 + $0x38] sm:$0xff]  ;;  %v1485_v22 = vld [vmem:[%s1889_s1 + $0x68] sm:$0xff]  }
  0x11   : > { %1334 = vmatpush3.bf16.msra.mxu0 %v1476_v1  ;;  %1347 = vmatprep.mubr.bf16.mxu0 %v183_v6  ;;  %v186_v19 = vpack.c.bf16 %v182_v18, %v181_v17  ;;  %v1484_v21 = vld [vmem:[%s1889_s1 + $0x70] sm:$0xff]   ;;  %v1486_v23 = vld [vmem:[%s1889_s1 + $0x60] sm:$0xff]   ;;  %v1487_v24 = vld [vmem:[%s1889_s1 + $0x58] sm:$0xff]  }
  0x12   : > { %1335 = vmatprep.subr.bf16.mxu0 %v1477_v2  ;;  %1357 = vmatprep.subr.bf16.mxu1 %v1484_v21  ;;  %v1488_v25 = vld [vmem:[%s1889_s1 + $0x50] sm:$0xff]   ;;  %v1489_v26 = vld [vmem:[%s1889_s1 + $0x48] sm:$0xff]   ;;  %v1490_v27 = vld [vmem:[%s1889_s1 + $0x40] sm:$0xff]  }
  0x13   : > { %1358 = vmatpush3.bf16.msra.mxu1 %v1484_v21  ;;  %v1156_v28 = vld [vmem:[%s1890_s2] ss:$0 sm:$0xff] }
  0x14   : > { %1359 = vmatprep.subr.bf16.mxu1 %v1485_v22 }
  0x15   : > { %1336 = vmatpush3.bf16.msra.mxu0 %v1477_v2 }
  0x16   : > { %1337 = vmatprep.subr.bf16.mxu0 %v1478_v3 }
  0x17   : > { %1360 = vmatpush3.bf16.msra.mxu1 %v1485_v22 }
  0x18   : > { %1361 = vmatprep.subr.bf16.mxu1 %v1486_v23 }
  0x19   : > { %1338 = vmatpush3.bf16.msra.mxu0 %v1478_v3 }
  0x1a   : > { %1339 = vmatprep.subr.bf16.mxu0 %v1479_v7 }
  0x1b   : > { %1362 = vmatpush3.bf16.msra.mxu1 %v1486_v23 }
  0x1c   : > { %1363 = vmatprep.subr.bf16.mxu1 %v1487_v24 }
  0x1d   : > { %1340 = vmatpush3.bf16.msra.mxu0 %v1479_v7 }
  0x1e   : > { %1341 = vmatprep.subr.bf16.mxu0 %v1480_v8 }
  0x1f   : > { %1364 = vmatpush3.bf16.msra.mxu1 %v1487_v24 }
  0x20   : > { %1365 = vmatprep.subr.bf16.mxu1 %v1488_v25 }
  0x21   : > { %1342 = vmatpush3.bf16.msra.mxu0 %v1480_v8 }
  0x22   : > { %1343 = vmatprep.subr.bf16.mxu0 %v1481_v9 }
  0x23   : > { %1366 = vmatpush3.bf16.msra.mxu1 %v1488_v25 }
  0x24   : > { %1367 = vmatprep.subr.bf16.mxu1 %v1489_v26 }
  0x25   : > { %1344 = vmatpush3.bf16.msra.mxu0 %v1481_v9 }
  0x26   : > { %1345 = vmatprep.subr.bf16.mxu0 %v1482_v10 }
  0x27   : > { %1368 = vmatpush3.bf16.msra.mxu1 %v1489_v26 }
  0x28   : > { %1369 = vmatprep.subr.bf16.mxu1 %v1490_v27 }
  0x29   : > { %1346 = vmatpush3.bf16.msra.mxu0 %v1482_v10 }
  0x2b   : > { %1370 = vmatpush3.bf16.msra.mxu1 %v1490_v27 }
  0x2c   : > { %1348 = vmatmul.mubr.bf16.vlgmr.msra.gmra.mxu0 %v184_v15 }
  0x2d   : > { %1351 = vmatprep.mubr.bf16.mxu0 %v185_v16 }
  0x34   : > { %1352 = vmatmul.mubr.bf16.gmra.mxu0 %v186_v19 }
  0xec   : > { %v1349_v29 = vpop.f32.mrf.mxu0 }
  0xed   : > { %v1748_v30 = vadd.f32 %v1349_v29, %v1156_v28 }
  0xee   : > { %v292_v31 = vpop.f32.mrf.mxu0 }
  0xef   : > { %v325_v32 = vsub.f32 0.0, %v1748_v30  ;;  %v1751_v33 = vadd.f32 %v1156_v28, %v292_v31 }
  0xf0   : > { %v1350_v34 = vpop.f32.mrf.mxu0 }
  0xf1   : > { %v335_v35 = vmul.f32 1.442695, %v325_v32  ;;  %v323_v36 = vsub.f32 0.0, %v1751_v33  ;;  %v304_v37 = vadd.f32 %v1350_v34, %v1156_v28 }
  0xf2   : > { %v295_v38 = vpop.f32.mrf.mxu0 }
  0xf3   : > { %v331_v39 = vmul.f32 1.442695, %v323_v36  ;;  %v326_v40 = vsub.f32 0.0, %v304_v37  ;;  %v296_v41 = vadd.f32 %v1156_v28, %v295_v38  ;;  %1515 = vpow2.f32 %v335_v35  ;;  %v1493_v35 = vld [vmem:[%s1889_s1 + $0xa8] sm:$0xff]   ;;  %v1494_v36 = vld [vmem:[%s1889_s1 + $0xa0] sm:$0xff]   ;;  %v1496_v38 = vld [vmem:[%s1889_s1 + $0x90] sm:$0xff]  }
  0xf4   : > { %v1353_v42 = vpop.f32.mrf.mxu0 }
  0xf5   : > { %1517 = vpow2.f32 %v331_v39  ;;  %v337_v43 = vmul.f32 1.442695, %v326_v40  ;;  %v324_v44 = vsub.f32 0.0, %v296_v41  ;;  %v1754_v45 = vadd.f32 %v1353_v42, %v1156_v28  ;;  %v1497_v39 = vld [vmem:[%s1889_s1 + $0x88] sm:$0xff]   ;;  %v1498_v40 = vld [vmem:[%s1889_s1 + $0x80] sm:$0xff]  }
  0xf6   : > { %v308_v46 = vpop.f32.mrf.mxu0 }
  0xf7   : > { %1519 = vpow2.f32 %v337_v43  ;;  %v333_v47 = vmul.f32 1.442695, %v324_v44  ;;  %v329_v48 = vsub.f32 0.0, %v1754_v45  ;;  %v309_v49 = vadd.f32 %v1156_v28, %v308_v46 }
  0xf8   : > { %v1354_v50 = vpop.f32.mrf.mxu0 }
  0xf9   : > { %1521 = vpow2.f32 %v333_v47  ;;  %v343_v51 = vmul.f32 1.442695, %v329_v48  ;;  %v327_v52 = vsub.f32 0.0, %v309_v49  ;;  %v320_v53 = vadd.f32 %v1354_v50, %v1156_v28 }
  0xfa   : > { %v311_v54 = vpop.f32.mrf.mxu0 }
  0xfb   : > { %v339_v55 = vmul.f32 1.442695, %v327_v52  ;;  %v330_v56 = vsub.f32 0.0, %v320_v53  ;;  %v312_v57 = vadd.f32 %v1156_v28, %v311_v54  ;;  %1523 = vpow2.f32 %v343_v51 }
  0xfd   : > { %1525 = vpow2.f32 %v339_v55  ;;  %v345_v58 = vmul.f32 1.442695, %v330_v56  ;;  %v328_v59 = vsub.f32 0.0, %v312_v57 }
  0xff   : > { %1527 = vpow2.f32 %v345_v58  ;;  %v341_v60 = vmul.f32 1.442695, %v328_v59 }
 0x100   : > { %v1516_v61 = vpop.eup %1515 }
 0x101   : > { %1529 = vpow2.f32 %v341_v60  ;;  %v349_v1 = vadd.f32 1.0, %v1516_v61 }
 0x102   : > { %v1518_v62 = vpop.eup %1517 }
 0x103   : > { %v347_v63 = vadd.f32 1.0, %v1518_v62 }
 0x104   : > { %v1520_v0 = vpop.eup %1519 }
 0x105   : > { %v350_v2 = vadd.f32 1.0, %v1520_v0  ;;  %1531 = vrcp.f32 %v347_v63 }
 0x106   : > { %v1522_v3 = vpop.eup %1521 }
 0x107   : > { %1533 = vrcp.f32 %v350_v2  ;;  %v348_v4 = vadd.f32 1.0, %v1522_v3 }
 0x108   : > { %1535 = vrcp.f32 %v349_v1  ;;  %v1524_v5 = vpop.eup %1523 }
 0x109   : > { %1537 = vrcp.f32 %v348_v4  ;;  %v353_v9 = vadd.f32 1.0, %v1524_v5 }
 0x10a   : > { %v1526_v6 = vpop.eup %1525 }
 0x10b   : > { %v351_v7 = vadd.f32 1.0, %v1526_v6 }
 0x10c   : > { %v1528_v8 = vpop.eup %1527 }
 0x10d   : > { %v354_v10 = vadd.f32 1.0, %v1528_v8  ;;  %1539 = vrcp.f32 %v351_v7 }
 0x10e   : > { %v1530_v11 = vpop.eup %1529 }
 0x10f   : > { %1541 = vrcp.f32 %v354_v10  ;;  %v352_v12 = vadd.f32 1.0, %v1530_v11 }
 0x110   : > { %1543 = vrcp.f32 %v353_v9 }
 0x111   : > { %1545 = vrcp.f32 %v352_v12 }
 0x112   : > { %v1532_v13 = vpop.eup %1531 }
 0x113   : > { %v363_v18 = vmul.f32 %v1532_v13, %v1751_v33  ;;  %v1492_v33 = vld [vmem:[%s1889_s1 + $0xb0] sm:$0xff]  }
 0x114   : > { %v1534_v14 = vpop.eup %1533 }
 0x115   : > { %v1536_v15 = vpop.eup %1535  ;;  %v366_v17 = vmul.f32 %v1534_v14, %v304_v37  ;;  %v1495_v37 = vld [vmem:[%s1889_s1 + $0x98] sm:$0xff]  }
 0x116   : > { %v1538_v16 = vpop.eup %1537  ;;  %v365_v20 = vmul.f32 %v1536_v15, %v1748_v30  ;;  %v1491_v30 = vld [vmem:[%s1889_s1 + $0xb8] sm:$0xff]  }
 0x117   : > { %v364_v19 = vmul.f32 %v1538_v16, %v296_v41  ;;  %1379 = vmatprep.subr.bf16.mxu0 %v1491_v30  ;;  %v1182_v41 = vld [vmem:[%s1890_s2 + $0x1] ss:$0 sm:$0xff] }
 0x118   : > { %v372_v22 = vpack.c.bf16 %v366_v17, %v365_v20  ;;  %1380 = vmatpush3.bf16.msra.mxu0 %v1491_v30 }
 0x119   : > { %v371_v21 = vpack.c.bf16 %v364_v19, %v363_v18  ;;  %1381 = vmatprep.subr.bf16.mxu0 %v1492_v33 }
 0x11a   : > { %v1540_v23 = vpop.eup %1539 }
 0x11b   : > { %1371 = vmatprep.mubr.bf16.mxu1 %v371_v21  ;;  %v367_v28 = vmul.f32 %v1540_v23, %v309_v49 }
 0x11c   : > { %v1542_v24 = vpop.eup %1541  ;;  %1372 = vmatmul.mubr.bf16.vlgmr.msra.gmra.mxu1 %v372_v22  ;;  %1382 = vmatpush3.bf16.msra.mxu0 %v1492_v33 }
 0x11d   : > { %v1544_v25 = vpop.eup %1543  ;;  %v370_v27 = vmul.f32 %v1542_v24, %v320_v53  ;;  %1383 = vmatprep.subr.bf16.mxu0 %v1493_v35 }
 0x11e   : > { %v1546_v26 = vpop.eup %1545  ;;  %v369_v31 = vmul.f32 %v1544_v25, %v1754_v45 }
 0x11f   : > { %v368_v29 = vmul.f32 %v1546_v26, %v312_v57 }
 0x120   : > { %v374_v34 = vpack.c.bf16 %v370_v27, %v369_v31  ;;  %1384 = vmatpush3.bf16.msra.mxu0 %v1493_v35 }
 0x121   : > { %v373_v32 = vpack.c.bf16 %v368_v29, %v367_v28  ;;  %1385 = vmatprep.subr.bf16.mxu0 %v1494_v36 }
 0x123   : > { %1375 = vmatprep.mubr.bf16.mxu1 %v373_v32 }
 0x124   : > { %1376 = vmatmul.mubr.bf16.gmra.mxu1 %v374_v34  ;;  %1386 = vmatpush3.bf16.msra.mxu0 %v1494_v36 }
 0x125   : > { %1387 = vmatprep.subr.bf16.mxu0 %v1495_v37 }
 0x128   : > { %1388 = vmatpush3.bf16.msra.mxu0 %v1495_v37 }
 0x129   : > { %1389 = vmatprep.subr.bf16.mxu0 %v1496_v38 }
 0x12c   : > { %1390 = vmatpush3.bf16.msra.mxu0 %v1496_v38 }
 0x12d   : > { %1391 = vmatprep.subr.bf16.mxu0 %v1497_v39 }
 0x130   : > { %1392 = vmatpush3.bf16.msra.mxu0 %v1497_v39 }
 0x131   : > { %1393 = vmatprep.subr.bf16.mxu0 %v1498_v40 }
 0x134   : > { %1394 = vmatpush3.bf16.msra.mxu0 %v1498_v40 }
 0x1dc   : > { %v1373_v42 = vpop.f32.mrf.mxu1 }
 0x1dd   : > { %v1787_v43 = vadd.f32 %v1373_v42, %v1182_v41 }
 0x1de   : > { %v482_v44 = vpop.f32.mrf.mxu1 }
 0x1df   : > { %v515_v45 = vsub.f32 0.0, %v1787_v43  ;;  %v1790_v46 = vadd.f32 %v1182_v41, %v482_v44 }
 0x1e0   : > { %v1374_v47 = vpop.f32.mrf.mxu1 }
 0x1e1   : > { %v525_v48 = vmul.f32 1.442695, %v515_v45  ;;  %v513_v49 = vsub.f32 0.0, %v1790_v46  ;;  %v494_v50 = vadd.f32 %v1374_v47, %v1182_v41 }
 0x1e2   : > { %v485_v51 = vpop.f32.mrf.mxu1 }
 0x1e3   : > { %v521_v52 = vmul.f32 1.442695, %v513_v49  ;;  %v516_v53 = vsub.f32 0.0, %v494_v50  ;;  %v486_v54 = vadd.f32 %v1182_v41, %v485_v51  ;;  %1547 = vpow2.f32 %v525_v48  ;;  %v1501_v48 = vld [vmem:[%s1889_s1 + $0xe8] sm:$0xff]   ;;  %v1502_v49 = vld [vmem:[%s1889_s1 + $0xe0] sm:$0xff]   ;;  %v1504_v51 = vld [vmem:[%s1889_s1 + $0xd0] sm:$0xff]  }
 0x1e4   : > { %v1377_v55 = vpop.f32.mrf.mxu1 }
 0x1e5   : > { %1549 = vpow2.f32 %v521_v52  ;;  %v527_v56 = vmul.f32 1.442695, %v516_v53  ;;  %v514_v57 = vsub.f32 0.0, %v486_v54  ;;  %v1793_v58 = vadd.f32 %v1377_v55, %v1182_v41  ;;  %v1505_v52 = vld [vmem:[%s1889_s1 + $0xc8] sm:$0xff]   ;;  %v1506_v53 = vld [vmem:[%s1889_s1 + $0xc0] sm:$0xff]  }
 0x1e6   : > { %v498_v59 = vpop.f32.mrf.mxu1 }
 0x1e7   : > { %1551 = vpow2.f32 %v527_v56  ;;  %v523_v60 = vmul.f32 1.442695, %v514_v57  ;;  %v519_v61 = vsub.f32 0.0, %v1793_v58  ;;  %v499_v62 = vadd.f32 %v1182_v41, %v498_v59 }
 0x1e8   : > { %v1378_v63 = vpop.f32.mrf.mxu1 }
 0x1e9   : > { %1553 = vpow2.f32 %v523_v60  ;;  %v533_v0 = vmul.f32 1.442695, %v519_v61  ;;  %v517_v1 = vsub.f32 0.0, %v499_v62  ;;  %v510_v2 = vadd.f32 %v1378_v63, %v1182_v41 }
 0x1ea   : > { %v501_v3 = vpop.f32.mrf.mxu1 }
 0x1eb   : > { %v529_v4 = vmul.f32 1.442695, %v517_v1  ;;  %v520_v5 = vsub.f32 0.0, %v510_v2  ;;  %v502_v6 = vadd.f32 %v1182_v41, %v501_v3  ;;  %1555 = vpow2.f32 %v533_v0 }
 0x1ed   : > { %1557 = vpow2.f32 %v529_v4  ;;  %v535_v7 = vmul.f32 1.442695, %v520_v5  ;;  %v518_v8 = vsub.f32 0.0, %v502_v6 }
 0x1ef   : > { %1559 = vpow2.f32 %v535_v7  ;;  %v531_v9 = vmul.f32 1.442695, %v518_v8 }
 0x1f0   : > { %v1548_v10 = vpop.eup %1547 }
 0x1f1   : > { %1561 = vpow2.f32 %v531_v9  ;;  %v539_v14 = vadd.f32 1.0, %v1548_v10 }
 0x1f2   : > { %v1550_v11 = vpop.eup %1549 }
 0x1f3   : > { %v537_v12 = vadd.f32 1.0, %v1550_v11 }
 0x1f4   : > { %v1552_v13 = vpop.eup %1551 }
 0x1f5   : > { %v540_v15 = vadd.f32 1.0, %v1552_v13  ;;  %1563 = vrcp.f32 %v537_v12 }
 0x1f6   : > { %v1554_v16 = vpop.eup %1553 }
 0x1f7   : > { %1565 = vrcp.f32 %v540_v15  ;;  %v538_v17 = vadd.f32 1.0, %v1554_v16 }
 0x1f8   : > { %1567 = vrcp.f32 %v539_v14  ;;  %v1556_v18 = vpop.eup %1555 }
 0x1f9   : > { %1569 = vrcp.f32 %v538_v17  ;;  %v543_v22 = vadd.f32 1.0, %v1556_v18 }
 0x1fa   : > { %v1558_v19 = vpop.eup %1557 }
 0x1fb   : > { %v541_v20 = vadd.f32 1.0, %v1558_v19 }
 0x1fc   : > { %v1560_v21 = vpop.eup %1559 }
 0x1fd   : > { %v544_v23 = vadd.f32 1.0, %v1560_v21  ;;  %1571 = vrcp.f32 %v541_v20 }
 0x1fe   : > { %v1562_v24 = vpop.eup %1561 }
 0x1ff   : > { %1573 = vrcp.f32 %v544_v23  ;;  %v542_v25 = vadd.f32 1.0, %v1562_v24 }
 0x200   : > { %1575 = vrcp.f32 %v543_v22 }
 0x201   : > { %1577 = vrcp.f32 %v542_v25 }
 0x202   : > { %v1564_v26 = vpop.eup %1563 }
 0x203   : > { %v553_v32 = vmul.f32 %v1564_v26, %v1790_v46  ;;  %v1500_v46 = vld [vmem:[%s1889_s1 + $0xf0] sm:$0xff]  }
 0x204   : > { %v1566_v27 = vpop.eup %1565 }
 0x205   : > { %v1568_v28 = vpop.eup %1567  ;;  %v556_v31 = vmul.f32 %v1566_v27, %v494_v50  ;;  %v1503_v50 = vld [vmem:[%s1889_s1 + $0xd8] sm:$0xff]  }
 0x206   : > { %v1570_v29 = vpop.eup %1569  ;;  %v555_v30 = vmul.f32 %v1568_v28, %v1787_v43  ;;  %v1499_v43 = vld [vmem:[%s1889_s1 + $0xf8] sm:$0xff]  }
 0x207   : > { %v554_v34 = vmul.f32 %v1570_v29, %v486_v54  ;;  %1403 = vmatprep.subr.bf16.mxu1 %v1499_v43  ;;  %v1208_v54 = vld [vmem:[%s1890_s2 + $0x2] ss:$0 sm:$0xff] }
 0x208   : > { %v562_v35 = vpack.c.bf16 %v556_v31, %v555_v30  ;;  %1404 = vmatpush3.bf16.msra.mxu1 %v1499_v43 }
 0x209   : > { %v561_v33 = vpack.c.bf16 %v554_v34, %v553_v32  ;;  %1405 = vmatprep.subr.bf16.mxu1 %v1500_v46 }
 0x20a   : > { %v1572_v36 = vpop.eup %1571 }
 0x20b   : > { %1395 = vmatprep.mubr.bf16.mxu0 %v561_v33  ;;  %v557_v41 = vmul.f32 %v1572_v36, %v499_v62 }
 0x20c   : > { %v1574_v37 = vpop.eup %1573  ;;  %1396 = vmatmul.mubr.bf16.vlgmr.msra.gmra.mxu0 %v562_v35  ;;  %1406 = vmatpush3.bf16.msra.mxu1 %v1500_v46 }
 0x20d   : > { %v1576_v38 = vpop.eup %1575  ;;  %v560_v40 = vmul.f32 %v1574_v37, %v510_v2  ;;  %1407 = vmatprep.subr.bf16.mxu1 %v1501_v48 }
 0x20e   : > { %v1578_v39 = vpop.eup %1577  ;;  %v559_v44 = vmul.f32 %v1576_v38, %v1793_v58 }
 0x20f   : > { %v558_v42 = vmul.f32 %v1578_v39, %v502_v6 }
 0x210   : > { %v564_v47 = vpack.c.bf16 %v560_v40, %v559_v44  ;;  %1408 = vmatpush3.bf16.msra.mxu1 %v1501_v48 }
 0x211   : > { %v563_v45 = vpack.c.bf16 %v558_v42, %v557_v41  ;;  %1409 = vmatprep.subr.bf16.mxu1 %v1502_v49 }
 0x213   : > { %1399 = vmatprep.mubr.bf16.mxu0 %v563_v45 }
 0x214   : > { %1400 = vmatmul.mubr.bf16.gmra.mxu0 %v564_v47  ;;  %1410 = vmatpush3.bf16.msra.mxu1 %v1502_v49 }
 0x215   : > { %1411 = vmatprep.subr.bf16.mxu1 %v1503_v50 }
 0x218   : > { %1412 = vmatpush3.bf16.msra.mxu1 %v1503_v50 }
 0x219   : > { %1413 = vmatprep.subr.bf16.mxu1 %v1504_v51 }
 0x21c   : > { %1414 = vmatpush3.bf16.msra.mxu1 %v1504_v51 }
 0x21d   : > { %1415 = vmatprep.subr.bf16.mxu1 %v1505_v52 }
 0x220   : > { %1416 = vmatpush3.bf16.msra.mxu1 %v1505_v52 }
 0x221   : > { %1417 = vmatprep.subr.bf16.mxu1 %v1506_v53 }
 0x224   : > { %1418 = vmatpush3.bf16.msra.mxu1 %v1506_v53 }
 0x2cc   : > { %v1397_v55 = vpop.f32.mrf.mxu0 }
 0x2cd   : > { %v1826_v56 = vadd.f32 %v1397_v55, %v1208_v54 }
 0x2ce   : > { %v672_v57 = vpop.f32.mrf.mxu0 }
 0x2cf   : > { %v705_v58 = vsub.f32 0.0, %v1826_v56  ;;  %v1829_v59 = vadd.f32 %v1208_v54, %v672_v57 }
 0x2d0   : > { %v1398_v60 = vpop.f32.mrf.mxu0 }
 0x2d1   : > { %v715_v61 = vmul.f32 1.442695, %v705_v58  ;;  %v703_v62 = vsub.f32 0.0, %v1829_v59  ;;  %v684_v63 = vadd.f32 %v1398_v60, %v1208_v54 }
 0x2d2   : > { %v675_v0 = vpop.f32.mrf.mxu0 }
 0x2d3   : > { %v711_v1 = vmul.f32 1.442695, %v703_v62  ;;  %v706_v2 = vsub.f32 0.0, %v684_v63  ;;  %v676_v3 = vadd.f32 %v1208_v54, %v675_v0  ;;  %1579 = vpow2.f32 %v715_v61  ;;  %v1509_v61 = vld [vmem:[%s1889_s1 + $0x128] sm:$0xff]   ;;  %v1510_v62 = vld [vmem:[%s1889_s1 + $0x120] sm:$0xff]   ;;  %v1512_v0 = vld [vmem:[%s1889_s1 + $0x110] sm:$0xff]  }
 0x2d4   : > { %v1401_v4 = vpop.f32.mrf.mxu0 }
 0x2d5   : > { %1581 = vpow2.f32 %v711_v1  ;;  %v717_v5 = vmul.f32 1.442695, %v706_v2  ;;  %v704_v6 = vsub.f32 0.0, %v676_v3  ;;  %v1832_v7 = vadd.f32 %v1401_v4, %v1208_v54  ;;  %v1513_v1 = vld [vmem:[%s1889_s1 + $0x108] sm:$0xff]   ;;  %v1514_v2 = vld [vmem:[%s1889_s1 + $0x100] sm:$0xff]  }
 0x2d6   : > { %v688_v8 = vpop.f32.mrf.mxu0 }
 0x2d7   : > { %1583 = vpow2.f32 %v717_v5  ;;  %v713_v9 = vmul.f32 1.442695, %v704_v6  ;;  %v709_v10 = vsub.f32 0.0, %v1832_v7  ;;  %v689_v11 = vadd.f32 %v1208_v54, %v688_v8 }
 0x2d8   : > { %v1402_v12 = vpop.f32.mrf.mxu0 }
 0x2d9   : > { %1585 = vpow2.f32 %v713_v9  ;;  %v723_v13 = vmul.f32 1.442695, %v709_v10  ;;  %v707_v14 = vsub.f32 0.0, %v689_v11  ;;  %v700_v15 = vadd.f32 %v1402_v12, %v1208_v54 }
 0x2da   : > { %v691_v16 = vpop.f32.mrf.mxu0 }
 0x2db   : > { %v719_v17 = vmul.f32 1.442695, %v707_v14  ;;  %v710_v18 = vsub.f32 0.0, %v700_v15  ;;  %v692_v19 = vadd.f32 %v1208_v54, %v691_v16  ;;  %1587 = vpow2.f32 %v723_v13 }
 0x2dd   : > { %1589 = vpow2.f32 %v719_v17  ;;  %v725_v20 = vmul.f32 1.442695, %v710_v18  ;;  %v708_v21 = vsub.f32 0.0, %v692_v19 }
 0x2df   : > { %1591 = vpow2.f32 %v725_v20  ;;  %v721_v22 = vmul.f32 1.442695, %v708_v21 }
 0x2e0   : > { %v1580_v23 = vpop.eup %1579 }
 0x2e1   : > { %1593 = vpow2.f32 %v721_v22  ;;  %v729_v27 = vadd.f32 1.0, %v1580_v23 }
 0x2e2   : > { %v1582_v24 = vpop.eup %1581 }
 0x2e3   : > { %v727_v25 = vadd.f32 1.0, %v1582_v24 }
 0x2e4   : > { %v1584_v26 = vpop.eup %1583 }
 0x2e5   : > { %v730_v28 = vadd.f32 1.0, %v1584_v26  ;;  %1595 = vrcp.f32 %v727_v25 }
 0x2e6   : > { %v1586_v29 = vpop.eup %1585 }
 0x2e7   : > { %1597 = vrcp.f32 %v730_v28  ;;  %v728_v31 = vadd.f32 1.0, %v1586_v29 }
 0x2e8   : > { %1599 = vrcp.f32 %v729_v27  ;;  %v1588_v32 = vpop.eup %1587 }
 0x2e9   : > { %1601 = vrcp.f32 %v728_v31  ;;  %v733_v35 = vadd.f32 1.0, %v1588_v32 }
 0x2ea   : > { %v1590_v34 = vpop.eup %1589 }
 0x2eb   : > { %v731_v30 = vadd.f32 1.0, %v1590_v34 }
 0x2ec   : > { %v1592_v33 = vpop.eup %1591 }
 0x2ed   : > { %v734_v36 = vadd.f32 1.0, %v1592_v33  ;;  %1603 = vrcp.f32 %v731_v30 }
 0x2ee   : > { %v1594_v37 = vpop.eup %1593 }
 0x2ef   : > { %1605 = vrcp.f32 %v734_v36  ;;  %v732_v38 = vadd.f32 1.0, %v1594_v37 }
 0x2f0   : > { %1607 = vrcp.f32 %v733_v35 }
 0x2f1   : > { %1609 = vrcp.f32 %v732_v38 }
 0x2f2   : > { %v1596_v39 = vpop.eup %1595 }
 0x2f3   : > { %v743_v45 = vmul.f32 %v1596_v39, %v1829_v59  ;;  %v1508_v59 = vld [vmem:[%s1889_s1 + $0x130] sm:$0xff]  }
 0x2f4   : > { %v1598_v40 = vpop.eup %1597 }
 0x2f5   : > { %v1600_v41 = vpop.eup %1599  ;;  %v746_v44 = vmul.f32 %v1598_v40, %v684_v63  ;;  %v1511_v63 = vld [vmem:[%s1889_s1 + $0x118] sm:$0xff]  }
 0x2f6   : > { %v1602_v42 = vpop.eup %1601  ;;  %v745_v43 = vmul.f32 %v1600_v41, %v1826_v56  ;;  %v1507_v56 = vld [vmem:[%s1889_s1 + $0x138] sm:$0xff]  }
 0x2f7   : > { %v744_v47 = vmul.f32 %v1602_v42, %v676_v3  ;;  %1427 = vmatprep.subr.bf16.mxu0 %v1507_v56  ;;  %1451 = vmatprep.subr.bf16.mxu1 %v1507_v56  ;;  %v1234_v3 = vld [vmem:[%s1890_s2 + $0x3] ss:$0 sm:$0xff] }
 0x2f8   : > { %v752_v48 = vpack.c.bf16 %v746_v44, %v745_v43  ;;  %1428 = vmatpush3.bf16.msra.mxu0 %v1507_v56 }
 0x2f9   : > { %v751_v46 = vpack.c.bf16 %v744_v47, %v743_v45  ;;  %1429 = vmatprep.subr.bf16.mxu0 %v1508_v59 }
 0x2fa   : > { %v1604_v49 = vpop.eup %1603 }
 0x2fb   : > { %1419 = vmatprep.mubr.bf16.mxu1 %v751_v46  ;;  %v747_v54 = vmul.f32 %v1604_v49, %v689_v11 }
 0x2fc   : > { %v1606_v50 = vpop.eup %1605  ;;  %1420 = vmatmul.mubr.bf16.vlgmr.msra.gmra.mxu1 %v752_v48  ;;  %1430 = vmatpush3.bf16.msra.mxu0 %v1508_v59 }
 0x2fd   : > { %v1608_v51 = vpop.eup %1607  ;;  %v750_v53 = vmul.f32 %v1606_v50, %v700_v15  ;;  %1459 = vmatpush3.bf16.msra.mxu1 %v1507_v56  ;;  %1431 = vmatprep.subr.bf16.mxu0 %v1509_v61 }
 0x2fe   : > { %v1610_v52 = vpop.eup %1609  ;;  %v749_v57 = vmul.f32 %v1608_v51, %v1832_v7  ;;  %1452 = vmatprep.subr.bf16.mxu1 %v1508_v59 }
 0x2ff   : > { %v748_v55 = vmul.f32 %v1610_v52, %v692_v19 }
 0x300   : > { %v754_v60 = vpack.c.bf16 %v750_v53, %v749_v57  ;;  %1432 = vmatpush3.bf16.msra.mxu0 %v1509_v61 }
 0x301   : > { %v753_v58 = vpack.c.bf16 %v748_v55, %v747_v54  ;;  %1460 = vmatpush3.bf16.msra.mxu1 %v1508_v59  ;;  %1433 = vmatprep.subr.bf16.mxu0 %v1510_v62 }
 0x302   : > { %1453 = vmatprep.subr.bf16.mxu1 %v1509_v61 }
 0x303   : > { %1423 = vmatprep.mubr.bf16.mxu1 %v753_v58 }
 0x304   : > { %1424 = vmatmul.mubr.bf16.gmra.mxu1 %v754_v60  ;;  %1434 = vmatpush3.bf16.msra.mxu0 %v1510_v62 }
 0x305   : > { %1461 = vmatpush3.bf16.msra.mxu1 %v1509_v61  ;;  %1435 = vmatprep.subr.bf16.mxu0 %v1511_v63 }
 0x306   : > { %1454 = vmatprep.subr.bf16.mxu1 %v1510_v62 }
 0x308   : > { %1436 = vmatpush3.bf16.msra.mxu0 %v1511_v63 }
 0x309   : > { %1462 = vmatpush3.bf16.msra.mxu1 %v1510_v62  ;;  %1437 = vmatprep.subr.bf16.mxu0 %v1512_v0 }
 0x30a   : > { %1455 = vmatprep.subr.bf16.mxu1 %v1511_v63 }
 0x30c   : > { %1438 = vmatpush3.bf16.msra.mxu0 %v1512_v0 }
 0x30d   : > { %1463 = vmatpush3.bf16.msra.mxu1 %v1511_v63  ;;  %1439 = vmatprep.subr.bf16.mxu0 %v1513_v1 }
 0x30e   : > { %1456 = vmatprep.subr.bf16.mxu1 %v1512_v0 }
 0x310   : > { %1440 = vmatpush3.bf16.msra.mxu0 %v1513_v1 }
 0x311   : > { %1464 = vmatpush3.bf16.msra.mxu1 %v1512_v0  ;;  %1441 = vmatprep.subr.bf16.mxu0 %v1514_v2 }
 0x312   : > { %1457 = vmatprep.subr.bf16.mxu1 %v1513_v1 }
 0x314   : > { %1442 = vmatpush3.bf16.msra.mxu0 %v1514_v2 }
 0x315   : > { %1465 = vmatpush3.bf16.msra.mxu1 %v1513_v1 }
 0x316   : > { %1458 = vmatprep.subr.bf16.mxu1 %v1514_v2 }
 0x319   : > { %1466 = vmatpush3.bf16.msra.mxu1 %v1514_v2 }
 0x3bc   : > { %v1421_v4 = vpop.f32.mrf.mxu1 }
 0x3bd   : > { %v1865_v5 = vadd.f32 %v1421_v4, %v1234_v3 }
 0x3be   : > { %v862_v6 = vpop.f32.mrf.mxu1 }
 0x3bf   : > { %v895_v7 = vsub.f32 0.0, %v1865_v5  ;;  %v1868_v8 = vadd.f32 %v1234_v3, %v862_v6 }
 0x3c0   : > { %v1422_v9 = vpop.f32.mrf.mxu1 }
 0x3c1   : > { %v905_v10 = vmul.f32 1.442695, %v895_v7  ;;  %v893_v11 = vsub.f32 0.0, %v1868_v8  ;;  %v874_v12 = vadd.f32 %v1422_v9, %v1234_v3 }
 0x3c2   : > { %v865_v13 = vpop.f32.mrf.mxu1 }
 0x3c3   : > { %v901_v14 = vmul.f32 1.442695, %v893_v11  ;;  %v896_v15 = vsub.f32 0.0, %v874_v12  ;;  %v866_v16 = vadd.f32 %v1234_v3, %v865_v13  ;;  %1611 = vpow2.f32 %v905_v10 }
 0x3c4   : > { %v1425_v17 = vpop.f32.mrf.mxu1 }
 0x3c5   : > { %1613 = vpow2.f32 %v901_v14  ;;  %v907_v18 = vmul.f32 1.442695, %v896_v15  ;;  %v894_v19 = vsub.f32 0.0, %v866_v16  ;;  %v1871_v20 = vadd.f32 %v1425_v17, %v1234_v3 }
 0x3c6   : > { %v878_v21 = vpop.f32.mrf.mxu1 }
 0x3c7   : > { %1615 = vpow2.f32 %v907_v18  ;;  %v903_v22 = vmul.f32 1.442695, %v894_v19  ;;  %v899_v23 = vsub.f32 0.0, %v1871_v20  ;;  %v879_v24 = vadd.f32 %v1234_v3, %v878_v21 }
 0x3c8   : > { %v1426_v25 = vpop.f32.mrf.mxu1 }
 0x3c9   : > { %1617 = vpow2.f32 %v903_v22  ;;  %v913_v26 = vmul.f32 1.442695, %v899_v23  ;;  %v897_v27 = vsub.f32 0.0, %v879_v24  ;;  %v890_v28 = vadd.f32 %v1426_v25, %v1234_v3 }
 0x3ca   : > { %v881_v29 = vpop.f32.mrf.mxu1 }
 0x3cb   : > { %v909_v31 = vmul.f32 1.442695, %v897_v27  ;;  %v900_v32 = vsub.f32 0.0, %v890_v28  ;;  %v882_v34 = vadd.f32 %v1234_v3, %v881_v29  ;;  %1619 = vpow2.f32 %v913_v26 }
 0x3cd   : > { %1621 = vpow2.f32 %v909_v31  ;;  %v915_v30 = vmul.f32 1.442695, %v900_v32  ;;  %v898_v33 = vsub.f32 0.0, %v882_v34 }
 0x3cf   : > { %1623 = vpow2.f32 %v915_v30  ;;  %v911_v35 = vmul.f32 1.442695, %v898_v33 }
 0x3d0   : > { %v1612_v36 = vpop.eup %1611 }
 0x3d1   : > { %1625 = vpow2.f32 %v911_v35  ;;  %v919_v40 = vadd.f32 1.0, %v1612_v36 }
 0x3d2   : > { %v1614_v37 = vpop.eup %1613 }
 0x3d3   : > { %v917_v38 = vadd.f32 1.0, %v1614_v37 }
 0x3d4   : > { %v1616_v39 = vpop.eup %1615 }
 0x3d5   : > { %v920_v41 = vadd.f32 1.0, %v1616_v39  ;;  %1627 = vrcp.f32 %v917_v38 }
 0x3d6   : > { %v1618_v42 = vpop.eup %1617 }
 0x3d7   : > { %1629 = vrcp.f32 %v920_v41  ;;  %v918_v44 = vadd.f32 1.0, %v1618_v42 }
 0x3d8   : > { %1631 = vrcp.f32 %v919_v40  ;;  %v1620_v45 = vpop.eup %1619 }
 0x3d9   : > { %1633 = vrcp.f32 %v918_v44  ;;  %v923_v48 = vadd.f32 1.0, %v1620_v45 }
 0x3da   : > { %v1622_v47 = vpop.eup %1621 }
 0x3db   : > { %v921_v43 = vadd.f32 1.0, %v1622_v47 }
 0x3dc   : > { %v1624_v46 = vpop.eup %1623 }
 0x3dd   : > { %v924_v49 = vadd.f32 1.0, %v1624_v46  ;;  %1635 = vrcp.f32 %v921_v43 }
 0x3de   : > { %v1626_v50 = vpop.eup %1625 }
 0x3df   : > { %1637 = vrcp.f32 %v924_v49  ;;  %v922_v51 = vadd.f32 1.0, %v1626_v50 }
 0x3e0   : > { %1639 = vrcp.f32 %v923_v48 }
 0x3e1   : > { %1641 = vrcp.f32 %v922_v51 }
 0x3e2   : > { %v1628_v52 = vpop.eup %1627 }
 0x3e3   : > { %v933_v58 = vmul.f32 %v1628_v52, %v1868_v8 }
 0x3e4   : > { %v1630_v53 = vpop.eup %1629 }
 0x3e5   : > { %v1632_v54 = vpop.eup %1631  ;;  %v936_v57 = vmul.f32 %v1630_v53, %v874_v12 }
 0x3e6   : > { %v1634_v55 = vpop.eup %1633  ;;  %v935_v56 = vmul.f32 %v1632_v54, %v1865_v5  ;;  %v1260_v5 = vld [vmem:[%s1890_s2 + $0x4] ss:$0 sm:$0xff] }
 0x3e7   : > { %v934_v60 = vmul.f32 %v1634_v55, %v866_v16 }
 0x3e8   : > { %v942_v61 = vpack.c.bf16 %v936_v57, %v935_v56 }
 0x3e9   : > { %v941_v59 = vpack.c.bf16 %v934_v60, %v933_v58 }
 0x3ea   : > { %v1636_v62 = vpop.eup %1635 }
 0x3eb   : > { %1443 = vmatprep.mubr.bf16.mxu0 %v941_v59  ;;  %v937_v3 = vmul.f32 %v1636_v62, %v879_v24 }
 0x3ec   : > { %v1638_v63 = vpop.eup %1637  ;;  %1444 = vmatmul.mubr.bf16.vlgmr.msra.gmra.mxu0 %v942_v61 }
 0x3ed   : > { %v1640_v0 = vpop.eup %1639  ;;  %v940_v2 = vmul.f32 %v1638_v63, %v890_v28 }
 0x3ee   : > { %v1642_v1 = vpop.eup %1641  ;;  %v939_v6 = vmul.f32 %v1640_v0, %v1871_v20 }
 0x3ef   : > { %v938_v4 = vmul.f32 %v1642_v1, %v882_v34 }
 0x3f0   : > { %v944_v9 = vpack.c.bf16 %v940_v2, %v939_v6 }
 0x3f1   : > { %v943_v7 = vpack.c.bf16 %v938_v4, %v937_v3 }
 0x3f3   : > { %1447 = vmatprep.mubr.bf16.mxu1 %v943_v7 }
 0x3f4   : > { %1448 = vmatmul.mubr.bf16.vlgmr.msra.gmra.mxu1 %v944_v9 }
 0x4ac   : > { %v1445_v8 = vpop.f32.mrf.mxu0 }
 0x4ad   : > { %v1061_v10 = vadd.f32 %v1445_v8, %v1260_v5 }
 0x4ae   : > { %v1052_v11 = vpop.f32.mrf.mxu0 }
 0x4af   : > { %1085 = vst [vmem:[%s172_s13 + $0x10] sm:$0xff] %v1061_v10  ;;  %v1053_v12 = vadd.f32 %v1260_v5, %v1052_v11 }
 0x4b0   : > { %v1446_v13 = vpop.f32.mrf.mxu0 }
 0x4b1   : > { %1083 = vst [vmem:[%s172_s13] sm:$0xff] %v1053_v12  ;;  %v1064_v14 = vadd.f32 %v1446_v13, %v1260_v5 }
 0x4b2   : > { %v1055_v15 = vpop.f32.mrf.mxu0 }
 0x4b3   : > { %1086 = vst [vmem:[%s172_s13 + $0x18] sm:$0xff] %v1064_v14  ;;  %v1056_v16 = vadd.f32 %v1260_v5, %v1055_v15 }
 0x4b4   : > { %v1449_v17 = vpop.f32.mrf.mxu1 }
 0x4b5   : > { %1084 = vst [vmem:[%s172_s13 + $0x8] sm:$0xff] %v1056_v16  ;;  %v1077_v18 = vadd.f32 %v1449_v17, %v1260_v5 }
 0x4b6   : > { %v1068_v19 = vpop.f32.mrf.mxu1 }
 0x4b7   : > { %1089 = vst [vmem:[%s172_s13 + $0x30] sm:$0xff] %v1077_v18  ;;  %v1069_v20 = vadd.f32 %v1260_v5, %v1068_v19 }
 0x4b8   : > { %v1450_v21 = vpop.f32.mrf.mxu1 }
 0x4b9   : > { %1087 = vst [vmem:[%s172_s13 + $0x20] sm:$0xff] %v1069_v20  ;;  %v1080_v22 = vadd.f32 %v1450_v21, %v1260_v5 }
 0x4ba   : > { %v1071_v23 = vpop.f32.mrf.mxu1 }
 0x4bb   : > { %1090 = vst [vmem:[%s172_s13 + $0x38] sm:$0xff] %v1080_v22  ;;  %v1072_v24 = vadd.f32 %v1260_v5, %v1071_v23 }
 0x4bd   : > { %1088 = vst [vmem:[%s172_s13 + $0x28] sm:$0xff] %v1072_v24 }
 0x4be PF: > { %s13_s12 = sadd.s32 1, %s1649_s12  }
 0x4bf   : > { %p10_p4 = scmp.ge.s32.totalorder %s13_s12, 4  }
 0x4c1   :  { %12 = sbr.rel (!%p10_p4) target bundleno = 1 (0x1), region = 70 }

</bundles_post_ra>
